<compile_context>
chip_gen: v7x
topology: tpu7x:2x2x1
jax: 0.10.0
libtpu: 0.0.40
codegen_flags: <defaults>
</compile_context>

<pallas_src>
import jax
import jax.numpy as jnp
from jax import lax
from jax.experimental import pallas as pl
from jax.experimental.pallas import tpu as pltpu


H1 = 50          # hidden width of each first-layer branch
H1X2 = 2 * H1    # fused first-layer width (100 <= 128 -> single lane tile)


def _sigmoid(x):
    # tanh form: one EUP op instead of exp + reciprocal/divide.
    return 0.5 * jnp.tanh(0.5 * x) + 0.5


def _softplus(x):
    # PyTorch F.softplus semantics (beta=1, threshold=20):
    #   x               if x > 20
    #   log1p(exp(x))   otherwise
    safe = jnp.minimum(x, 20.0)
    return jnp.where(x > 20.0, x, jnp.log1p(jnp.exp(safe)))


def actor_critic_kernel(state_ref, l1_w_ref, l1_b_ref, head_w_ref, head_b_ref, out_ref):
    x = state_ref[...]  # [TB, 3]

    # Fused layer 1: columns [0:50] = a1 branch, columns [50:100] = value1 branch.
    h_pre = (
        jnp.dot(x, l1_w_ref[...], preferred_element_type=jnp.float32) + l1_b_ref[...]
    )                                   # [TB, 100]
    h = _sigmoid(h_pre)                 # [a1 | value1]

    # b1 = sigmoid(a1) (double sigmoid, per reference forward) applied only to the
    # a1 half; value1 half passes through. Column select avoids lane slicing/concat.
    col_h = lax.broadcasted_iota(jnp.int32, h.shape, 1)
    x_cat = jnp.where(col_h < H1, _sigmoid(h), h)   # [b1 | value1], [TB, 100]

    # Fused heads: block-diagonal [100, 3] weight ->
    #   col 0: mu pre-act, col 1: sigma pre-act, col 2: folded value-head result.
    pre = (
        jnp.dot(x_cat, head_w_ref[...], preferred_element_type=jnp.float32)
        + head_b_ref[...]
    )                                   # [TB, 3]

    col = lax.broadcasted_iota(jnp.int32, pre.shape, 1)
    out = jnp.where(
        col == 0,
        jnp.tanh(pre),                  # mu
        jnp.where(col == 1, _softplus(pre) + 0.001, pre),  # sigma | value
    )
    out_ref[...] = out.astype(out_ref.dtype)


def actor_critic_forward(state, packed_params, *, tb=512):
    """state: [B, 3] f32. packed_params: (l1_w [3,100], l1_b [1,100],
    head_w [100,3], head_b [1,3]). Returns (mu, sigma, value), each [B, 1]."""
    l1_w, l1_b, head_w, head_b = packed_params
    B = state.shape[0]

    # Batch tile: multiple of 8 (sublane), capped at `tb`; pad batch to a multiple.
    TB = min(int(tb), ((B + 7) // 8) * 8)
    Bp = ((B + TB - 1) // TB) * TB
    if Bp != B:
        state = jnp.pad(state, ((0, Bp - B), (0, 0)))
    grid = (Bp // TB,)

    out = pl.pallas_call(
        actor_critic_kernel,
        out_shape=jax.ShapeDtypeStruct((Bp, 3), jnp.float32),
        grid_spec=pltpu.PrefetchScalarGridSpec(
            num_scalar_prefetch=0,
            grid=grid,
            in_specs=[
                pl.BlockSpec((TB, 3), lambda i: (i, 0)),      # state tile
                pl.BlockSpec((3, H1X2), lambda i: (0, 0)),    # fused layer-1 weight
                pl.BlockSpec((1, H1X2), lambda i: (0, 0)),    # fused layer-1 bias
                pl.BlockSpec((H1X2, 3), lambda i: (0, 0)),    # fused head weight
                pl.BlockSpec((1, 3), lambda i: (0, 0)),       # fused head bias
            ],
            out_specs=pl.BlockSpec((TB, 3), lambda i: (i, 0)),
        ),
        compiler_params=pltpu.CompilerParams(
            dimension_semantics=("parallel",),
        ),
    )(state, l1_w, l1_b, head_w, head_b)

    mu = out[:B, 0:1]
    sigma = out[:B, 1:2]
    value = out[:B, 2:3]
    return mu, sigma, value


def init_params(key):
    """Deterministic synthetic init.

    Matches set_init semantics (weights ~ N(0, 0.1), biases = 0) for the layers
    the module initializes; value2's weight also uses N(0, 0.1) here for
    simplicity (synthetic kernel, not a checkpoint).
    Weights are stored as [in, out] (transposed from PyTorch's [out, in]).
    """
    ks = jax.random.split(key, 6)

    def w(k, shape):
        return (0.1 * jax.random.normal(k, shape)).astype(jnp.float32)

    return {
        "a1_w": w(ks[0], (3, H1)),    "a1_b": jnp.zeros((1, H1), jnp.float32),
        "v1_w": w(ks[1], (3, H1)),    "v1_b": jnp.zeros((1, H1), jnp.float32),
        "mu_w": w(ks[2], (H1, 1)),    "mu_b": jnp.zeros((1, 1), jnp.float32),
        "sg_w": w(ks[3], (H1, 1)),    "sg_b": jnp.zeros((1, 1), jnp.float32),
        "v2_w": w(ks[4], (H1, H1)),   "v2_b": jnp.zeros((1, H1), jnp.float32),
        "val_w": w(ks[5], (H1, 1)),   "val_b": jnp.zeros((1, 1), jnp.float32),
    }


def pack_params(p):
    """Host-side fusion of the 12 raw parameters into 4 kernel slabs."""
    # Fold the two value-head Linears (no activation between them): exact up to fp reassoc.
    val_fused_w = p["v2_w"] @ p["val_w"]                  # [50, 1]
    val_fused_b = p["v2_b"] @ p["val_w"] + p["val_b"]     # [1, 1]

    # Fused layer-1: [a1 | value1]
    l1_w = jnp.concatenate([p["a1_w"], p["v1_w"]], axis=1)        # [3, 100]
    l1_b = jnp.concatenate([p["a1_b"], p["v1_b"]], axis=1)        # [1, 100]

    # Block-diagonal fused head weight over the [b1 | value1] activation.
    head_w = jnp.zeros((H1X2, 3), jnp.float32)
    head_w = head_w.at[:H1, 0].set(p["mu_w"][:, 0])
    head_w = head_w.at[:H1, 1].set(p["sg_w"][:, 0])
    head_w = head_w.at[H1:, 2].set(val_fused_w[:, 0])
    head_b = jnp.concatenate([p["mu_b"], p["sg_b"], val_fused_b], axis=1)  # [1, 3]

    return l1_w, l1_b, head_w, head_b


def reference_forward(state, p):
    """Pure-JAX reference (unfused, standard sigmoid) for verification."""
    sig = lambda x: 1.0 / (1.0 + jnp.exp(-x))
    a1 = sig(state @ p["a1_w"] + p["a1_b"])
    value1 = sig(state @ p["v1_w"] + p["v1_b"])
    b1 = sig(a1)
    mu = jnp.tanh(b1 @ p["mu_w"] + p["mu_b"])
    sigma = jax.nn.softplus(b1 @ p["sg_w"] + p["sg_b"]) + 0.001
    value2 = value1 @ p["v2_w"] + p["v2_b"]
    value = value2 @ p["val_w"] + p["val_b"]
    return mu, sigma, value


if __name__ == "__main__":
    key = jax.random.PRNGKey(0)
    k_param, k_state = jax.random.split(key)

    params = init_params(k_param)
    packed = pack_params(params)

    # state = [stock_price, option_price, current_time] per batch element.
    B = 8
    state = jax.random.uniform(
        k_state, (B, 3), dtype=jnp.float32, minval=0.0, maxval=5.0
    )

    mu, sigma, value = actor_critic_forward(state, packed)
    jax.block_until_ready((mu, sigma, value))

    # Sanity check against the pure-JAX (unfused) reference.
    # Fused value head + tanh-form sigmoid differ only by fp reassociation (~1e-6).
    mu_r, sigma_r, value_r = reference_forward(state, params)
    assert mu.shape == (B, 1) and sigma.shape == (B, 1) and value.shape == (B, 1)
    assert jnp.allclose(mu, mu_r, atol=1e-4, rtol=1e-4)
    assert jnp.allclose(sigma, sigma_r, atol=1e-4, rtol=1e-4)
    assert jnp.allclose(value, value_r, atol=1e-4, rtol=1e-4)

    print("KERNEL_OK")
</pallas_src>

<mosaic_0001>
module attributes {stable_mosaic.version = 11 : i64} {
  func.func @actor_critic_kernel(%arg0: i32, %arg1: memref<8x3xf32, #tpu.memory_space<vmem>>, %arg2: memref<3x100xf32, #tpu.memory_space<vmem>>, %arg3: memref<1x100xf32, #tpu.memory_space<vmem>>, %arg4: memref<100x3xf32, #tpu.memory_space<vmem>>, %arg5: memref<1x3xf32, #tpu.memory_space<vmem>>, %arg6: memref<8x3xf32, #tpu.memory_space<vmem>>) attributes {dimension_semantics = [#tpu.dimension_semantics<parallel>], iteration_bounds = array<i64: 1>, scalar_prefetch = 0 : i64, scratch_operands = 0 : i64, tpu.core_type = #tpu.core_type<tc>, window_params = [{transform_indices = @transform_0, window_bounds = array<i64: 8, 3>}, {pipeline_mode = #tpu.pipeline_mode<synchronous>, transform_indices = @transform_1, window_bounds = array<i64: 3, 100>}, {pipeline_mode = #tpu.pipeline_mode<synchronous>, transform_indices = @transform_2, window_bounds = array<i64: 1, 100>}, {pipeline_mode = #tpu.pipeline_mode<synchronous>, transform_indices = @transform_3, window_bounds = array<i64: 100, 3>}, {pipeline_mode = #tpu.pipeline_mode<synchronous>, transform_indices = @transform_4, window_bounds = array<i64: 1, 3>}, {transform_indices = @transform_5, window_bounds = array<i64: 8, 3>}]} {
    %c0 = arith.constant 0 : index
    %c0_0 = arith.constant 0 : index
    %0 = vector.load %arg1[%c0, %c0_0] : memref<8x3xf32, #tpu.memory_space<vmem>>, vector<8x3xf32>
    %c0_1 = arith.constant 0 : index
    %c0_2 = arith.constant 0 : index
    %1 = vector.load %arg2[%c0_1, %c0_2] : memref<3x100xf32, #tpu.memory_space<vmem>>, vector<3x100xf32>
    %cst = arith.constant dense<0.000000e+00> : vector<8x100xf32>
    %2 = tpu.matmul %0, %1, %cst {dimension_numbers = #tpu.dot_dimension_numbers<[1], [0], [0], [1], [0, 0, 1, 1], [], []>} : vector<8x3xf32>, vector<3x100xf32>, vector<8x100xf32> -> vector<8x100xf32>
    %c0_3 = arith.constant 0 : index
    %c0_4 = arith.constant 0 : index
    %3 = vector.load %arg3[%c0_3, %c0_4] : memref<1x100xf32, #tpu.memory_space<vmem>>, vector<1x100xf32>
    %4 = vector.broadcast %3 : vector<1x100xf32> to vector<8x100xf32>
    %5 = arith.addf %2, %4 : vector<8x100xf32>
    %cst_5 = arith.constant 5.000000e-01 : f32
    %6 = vector.broadcast %cst_5 : f32 to vector<8x100xf32>
    %7 = arith.mulf %6, %5 : vector<8x100xf32>
    %8 = math.tanh %7 : vector<8x100xf32>
    %cst_6 = arith.constant 5.000000e-01 : f32
    %9 = vector.broadcast %cst_6 : f32 to vector<8x100xf32>
    %10 = arith.mulf %9, %8 : vector<8x100xf32>
    %cst_7 = arith.constant 5.000000e-01 : f32
    %11 = vector.broadcast %cst_7 : f32 to vector<8x100xf32>
    %12 = arith.addf %10, %11 : vector<8x100xf32>
    %13 = tpu.iota {dimensions = array<i32: 1>} : vector<8x100xi32>
    %c50_i32 = arith.constant 50 : i32
    %14 = vector.broadcast %c50_i32 : i32 to vector<8x100xi32>
    %15 = arith.cmpi slt, %13, %14 : vector<8x100xi32>
    %cst_8 = arith.constant 5.000000e-01 : f32
    %16 = vector.broadcast %cst_8 : f32 to vector<8x100xf32>
    %17 = arith.mulf %16, %12 : vector<8x100xf32>
    %18 = math.tanh %17 : vector<8x100xf32>
    %cst_9 = arith.constant 5.000000e-01 : f32
    %19 = vector.broadcast %cst_9 : f32 to vector<8x100xf32>
    %20 = arith.mulf %19, %18 : vector<8x100xf32>
    %cst_10 = arith.constant 5.000000e-01 : f32
    %21 = vector.broadcast %cst_10 : f32 to vector<8x100xf32>
    %22 = arith.addf %20, %21 : vector<8x100xf32>
    %23 = arith.select %15, %22, %12 : vector<8x100xi1>, vector<8x100xf32>
    %c0_11 = arith.constant 0 : index
    %c0_12 = arith.constant 0 : index
    %24 = vector.load %arg4[%c0_11, %c0_12] : memref<100x3xf32, #tpu.memory_space<vmem>>, vector<100x3xf32>
    %cst_13 = arith.constant dense<0.000000e+00> : vector<8x3xf32>
    %25 = tpu.matmul %23, %24, %cst_13 {dimension_numbers = #tpu.dot_dimension_numbers<[1], [0], [0], [1], [0, 0, 1, 1], [], []>} : vector<8x100xf32>, vector<100x3xf32>, vector<8x3xf32> -> vector<8x3xf32>
    %c0_14 = arith.constant 0 : index
    %c0_15 = arith.constant 0 : index
    %26 = vector.load %arg5[%c0_14, %c0_15] : memref<1x3xf32, #tpu.memory_space<vmem>>, vector<1x3xf32>
    %27 = vector.broadcast %26 : vector<1x3xf32> to vector<8x3xf32>
    %28 = arith.addf %25, %27 : vector<8x3xf32>
    %29 = tpu.iota {dimensions = array<i32: 1>} : vector<8x3xi32>
    %c0_i32 = arith.constant 0 : i32
    %30 = vector.broadcast %c0_i32 : i32 to vector<8x3xi32>
    %31 = arith.cmpi eq, %29, %30 : vector<8x3xi32>
    %32 = math.tanh %28 : vector<8x3xf32>
    %c1_i32 = arith.constant 1 : i32
    %33 = vector.broadcast %c1_i32 : i32 to vector<8x3xi32>
    %34 = arith.cmpi eq, %29, %33 : vector<8x3xi32>
    %cst_16 = arith.constant 2.000000e+01 : f32
    %35 = vector.broadcast %cst_16 : f32 to vector<8x3xf32>
    %36 = arith.minimumf %28, %35 : vector<8x3xf32>
    %cst_17 = arith.constant 2.000000e+01 : f32
    %37 = vector.broadcast %cst_17 : f32 to vector<8x3xf32>
    %38 = arith.cmpf ogt, %28, %37 : vector<8x3xf32>
    %39 = math.exp %36 : vector<8x3xf32>
    %40 = math.log1p %39 : vector<8x3xf32>
    %41 = arith.select %38, %28, %40 : vector<8x3xi1>, vector<8x3xf32>
    %cst_18 = arith.constant 1.000000e-03 : f32
    %42 = vector.broadcast %cst_18 : f32 to vector<8x3xf32>
    %43 = arith.addf %41, %42 : vector<8x3xf32>
    %44 = arith.select %34, %43, %28 : vector<8x3xi1>, vector<8x3xf32>
    %45 = arith.select %31, %32, %44 : vector<8x3xi1>, vector<8x3xf32>
    %c0_19 = arith.constant 0 : index
    %c0_20 = arith.constant 0 : index
    %46 = vector.load %arg6[%c0_19, %c0_20] : memref<8x3xf32, #tpu.memory_space<vmem>>, vector<8x3xf32>
    tpu.vector_store %arg6[%c0_19, %c0_20], %45 {strides = array<i32>} : memref<8x3xf32, #tpu.memory_space<vmem>>, vector<8x3xf32>,
    return
  }
  func.func @transform_0(%arg0: i32) -> (i32, i32) {
    %c0_i32 = arith.constant 0 : i32
    %c0_i32_0 = arith.constant 0 : i32
    return %arg0, %c0_i32 : i32, i32
  }
  func.func @transform_1(%arg0: i32) -> (i32, i32) {
    %c0_i32 = arith.constant 0 : i32
    %c0_i32_0 = arith.constant 0 : i32
    %c0_i32_1 = arith.constant 0 : i32
    return %c0_i32, %c0_i32_0 : i32, i32
  }
  func.func @transform_2(%arg0: i32) -> (i32, i32) {
    %c0_i32 = arith.constant 0 : i32
    %c0_i32_0 = arith.constant 0 : i32
    %c0_i32_1 = arith.constant 0 : i32
    return %c0_i32, %c0_i32_0 : i32, i32
  }
  func.func @transform_3(%arg0: i32) -> (i32, i32) {
    %c0_i32 = arith.constant 0 : i32
    %c0_i32_0 = arith.constant 0 : i32
    %c0_i32_1 = arith.constant 0 : i32
    return %c0_i32, %c0_i32_0 : i32, i32
  }
  func.func @transform_4(%arg0: i32) -> (i32, i32) {
    %c0_i32 = arith.constant 0 : i32
    %c0_i32_0 = arith.constant 0 : i32
    %c0_i32_1 = arith.constant 0 : i32
    return %c0_i32, %c0_i32_0 : i32, i32
  }
  func.func @transform_5(%arg0: i32) -> (i32, i32) {
    %c0_i32 = arith.constant 0 : i32
    %c0_i32_0 = arith.constant 0 : i32
    return %arg0, %c0_i32 : i32, i32
  }
}

</mosaic_0001>

<bundles_post_ra>
// kernel: tpu_custom_call.1
= control target key start
LH: loop header
LB: loop body
LE: loop exit
PB: predicated region body
PF: predicated region fallthrough
CT: control target
= control target key end

     0   :  { %vm33_vm0 = vcmask 1042432   ;;  %vm29_vm1 = vcmask 23552   ;;  %v329_v0 = vmov 0.0   ;;  %vm330_vm2 = vmmov 0   ;;  %s418_s1 = inlined_call_operand.vmem [shape: f32[3,100], index: 1, kind: input, shape index: {}]   ;;  %s419_s0 = inlined_call_operand.vmem [shape: f32[8,3], index: 0, kind: input, shape index: {}]   ;;  %s420_s3 = inlined_call_operand.vmem [shape: f32[100,3], index: 3, kind: input, shape index: {}]   ;;  %s421_s2 = inlined_call_operand.vmem [shape: f32[1,100], index: 2, kind: input, shape index: {}]   ;;  %s422_s4 = inlined_call_operand.vmem [shape: f32[1,3], index: 4, kind: input, shape index: {}]   ;;  %s423_s5 = inlined_call_operand.vmem [shape: f32[8,3], index: 5, kind: output, shape index: {}]  }
   0x1   :  { %264 = vmatprep.subr.mxu0 %v329_v0  ;;  %v21_v1 = vld [vmem:[%s418_s1] sm:$0x7]  ;;  %266 = vmatprep.mubr.msk.f32.mxu0 %vm330_vm2, %v329_v0  ;;  %v120_v4 = vld [vmem:[%s420_s3 + $0x8] sm:$0xff]  ;;  %v331_v6 = vmov 0.0|0.0   ;;  %v121_v7 = vld [vmem:[%s420_s3 + $0x10] sm:$0xff]  ;;  %vm143_vm3 = vcmask 1043456   ;;  %v111_v32 = vlaneseq }
   0x2   :  { %v20_v2 = vld [vmem:[%s419_s0] sm:$0xff]  ;;  %265 = vmatpush3.msk.msra.mxu0 %vm33_vm0, %v21_v1  ;;  %295 = vmatprep.mubr.msk.f32.mxu1 %vm330_vm2, %v329_v0  ;;  %v122_v8 = vld [vmem:[%s420_s3 + $0x18] sm:$0xff]  ;;  %v124_v11 = vld [vmem:[%s420_s3 + $0x28] sm:$0xff]  ;;  %vm139_vm5 = vcmask 818176  }
   0x3   :  { %267 = vmatmul.mubr.msk.f32.vlgmr.msra.gmra.mrb[0].mxu0 %vm29_vm1, %v20_v2  ;;  %v119_v3 = vld [vmem:[%s420_s3] sm:$0xff]  ;;  %298 = vmatprep.subr.bf16.mxu1 %v331_v6  ;;  %v302_v9 = vpack.c.bf16 %v122_v8, %v121_v7  ;;  %v125_v13 = vld [vmem:[%s420_s3 + $0x30] sm:$0xff]  ;;  %v126_v14 = vld [vmem:[%s420_s3 + $0x38] sm:$0xff]  ;;  %v112_v33 = vand.u32 127, %v111_v32 }
   0x4   :  { %v299_v5 = vpack.c.bf16 %v120_v4, %v119_v3  ;;  %v123_v10 = vld [vmem:[%s420_s3 + $0x20] sm:$0xff]  ;;  %v308_v16 = vpack.c.bf16 %v126_v14, %v125_v13  ;;  %v128_v17 = vld [vmem:[%s420_s3 + $0x48] sm:$0xff]  ;;  %v129_v19 = vld [vmem:[%s420_s3 + $0x50] sm:$0xff] }
   0x5   :  { %v305_v12 = vpack.c.bf16 %v124_v11, %v123_v10  ;;  %v127_v15 = vld [vmem:[%s420_s3 + $0x40] sm:$0xff]  ;;  %v130_v20 = vld [vmem:[%s420_s3 + $0x58] sm:$0xff]  ;;  %vm113_vm4 = vcmp.lt.s32.totalorder %v112_v33, 50  ;;  %vm219_vm8 = vcmp.eq.s32.totalorder %v112_v33, 1  ;;  %vm217_vm9 = vcmp.eq.s32.totalorder %v112_v33, 0 }
   0x6   :  { %300 = vmatpush3.bf16.msra.mxu1 %v299_v5  ;;  %v311_v18 = vpack.c.bf16 %v128_v17, %v127_v15  ;;  %v314_v21 = vpack.c.bf16 %v130_v20, %v129_v19  ;;  %v131_v22 = vld [vmem:[%s420_s3 + $0x60] sm:$0xf] }
   0x7   :  { %301 = vmatprep.subr.bf16.mxu1 %v331_v6  ;;  %v242_v23 = vld [vmem:[%s421_s2] ss:$0 sm:$0xff] }
   0x8   :  { %v245_v38 = vld [vmem:[%s422_s4] ss:$0 sm:$0xff] }
   0xa   :  { %303 = vmatpush3.bf16.msra.mxu1 %v302_v9 }
   0xb   :  { %304 = vmatprep.subr.bf16.mxu1 %v331_v6 }
   0xe   :  { %306 = vmatpush3.bf16.msra.mxu1 %v305_v12 }
   0xf   :  { %307 = vmatprep.subr.bf16.mxu1 %v331_v6 }
  0x12   :  { %309 = vmatpush3.bf16.msra.mxu1 %v308_v16 }
  0x13   :  { %310 = vmatprep.subr.bf16.mxu1 %v331_v6 }
  0x16   :  { %312 = vmatpush3.bf16.msra.mxu1 %v311_v18 }
  0x17   :  { %313 = vmatprep.subr.bf16.mxu1 %v331_v6 }
  0x1a   :  { %315 = vmatpush3.bf16.msra.mxu1 %v314_v21 }
  0x1b   :  { %293 = vmatprep.subr.mxu1 %v329_v0 }
  0x1e   :  { %294 = vmatpush3.msk.msra.mxu1 %vm143_vm3, %v131_v22 }
  0xd6   :  { %v103_v24 = vpop.f32.mrb[0].mxu0 }
  0xd7   :  { %v104_v25 = vadd.f32 %v242_v23, %v103_v24  ;;  %v268_v26 = vpop.f32.mrb[1].mxu0 }
  0xd9   :  { %v107_v27 = vmul.f32 0.5, %v104_v25 }
  0xdb   :  { %319 = vtanh.f32 %v107_v27 }
  0xe5   :  { %v320_v28 = vpop.eup %319 }
  0xe6   :  { %v109_v29 = vmul.f32 0.5, %v320_v28 }
  0xe8   :  { %v110_v30 = vadd.f32 0.5, %v109_v29 }
  0xea   :  { %v114_v31 = vmul.f32 0.5, %v110_v30 }
  0xec   :  { %321 = vtanh.f32 %v114_v31 }
  0xf6   :  { %v322_v34 = vpop.eup %321 }
  0xf7   :  { %v116_v35 = vmul.f32 0.5, %v322_v34 }
  0xf9   :  { %v117_v36 = vadd.f32 0.5, %v116_v35 }
  0xfb   :  { %v118_v37 = vsel %vm113_vm4, %v117_v36, %v110_v30 }
  0xfc   :  { %296 = vmatmul.mubr.msk.f32.vlgmr.msra.gmra.mrb[0].mxu1 %vm139_vm5, %v118_v37 }
 0x1cf   :  { %v213_v39 = vpop.f32.mrb[0].mxu1 }
 0x1d0   :  { %v214_v40 = vadd.f32 %v245_v38, %v213_v39  ;;  %v297_v41 = vpop.f32.mrb[1].mxu1 }
 0x1d2   :  { %v220_v42 = vmin.f32 %v214_v40, 20.0  ;;  %vm221_vm7 = vcmp.gt.f32.partialorder %v214_v40, 20.0 }
 0x1d4   :  { %v222_v43 = vmul.f32 1.442695, %v220_v42 }
 0x1d6   :  { %323 = vpow2.f32 %v222_v43 }
 0x1e0   :  { %v324_v44 = vpop.eup %323 }
 0x1e1   :  { %v224_v45 = vadd.f32 1.0, %v324_v44  ;;  %v227_v46 = vmul.f32 -0.5, %v324_v44  ;;  %v230_v48 = vand.u32 2147483647, %v324_v44 }
 0x1e3   :  { %325 = vlog2.f32 %v224_v45  ;;  %v228_v47 = vadd.f32 1.0, %v227_v46  ;;  %vm231_vm6 = vcmp.lt.f32.partialorder %v230_v48, 0.0004427343 }
 0x1e4   :  { %327 = vtanh.f32 %v214_v40 }
 0x1e5   :  { %v229_v51 = vmul.f32 %v324_v44, %v228_v47 }
 0x1ed   :  { %v326_v49 = vpop.eup %325 }
 0x1ee   :  { %v226_v50 = vmul.f32 0.6931472, %v326_v49  ;;  %v328_v55 = vpop.eup %327 }
 0x1f0   :  { %v232_v52 = vsel %vm231_vm6, %v229_v51, %v226_v50 }
 0x1f1   :  { %v233_v53 = vsel %vm221_vm7, %v214_v40, %v232_v52 }
 0x1f2   :  { %v234_v54 = vadd.f32 0.001, %v233_v53 }
 0x1f4   :  { %v235_v56 = vsel %vm219_vm8, %v234_v54, %v214_v40 }
 0x1f5   :  { %v236_v57 = vsel %vm217_vm9, %v328_v55, %v235_v56 }
 0x1f6   :  { %237 = vst.msk [vmem:[%s423_s5] sm:$0xff] %vm29_vm1, %v236_v57 }

</bundles_post_ra>
